<compile_context>
chip_gen: v6e
topology: v6e:2x2x1
jax: 0.10.0
libtpu: 0.0.40
codegen_flags: <defaults>
</compile_context>

<pallas_src>
import jax
import jax.numpy as jnp
from jax.experimental import pallas as pl
from jax.experimental.pallas import tpu as pltpu


def _round_up(x, m):
    return ((x + m - 1) // m) * m


def _cdiv(a, b):
    return (a + b - 1) // b


def _make_kernel(h1):
    """h1: static (padded) width of the fc1 output inside the fused matmul."""

    def kernel(x_ref, w_in_ref, b1_ref, w2o_ref, b2_ref, w3_ref, b3_ref, out_ref):
        # One MXU pass covers fc1 AND the action half of fc2:
        #   y[:, :H1] = obs @ W1        y[:, H1:] = action @ W2a
        y = jnp.dot(x_ref[...], w_in_ref[...],
                    preferred_element_type=jnp.float32)          # (tm, H1+H2) f32

        # fc1 bias + relu in f32 (VPU).  Slice at a lane-tile boundary
        # (H1 is a multiple of 128) -> no relayout.
        h1a = jnp.maximum(y[:, :h1] + b1_ref[...], 0.0)

        # fc2:  cat([h1, action]) @ W2 == h1 @ W2o + action @ W2a  (exact).
        # Cast h1 to bf16 only at the MXU boundary; f32 accumulation.
        h2 = jnp.dot(h1a.astype(jnp.bfloat16), w2o_ref[...],
                     preferred_element_type=jnp.float32)
        h2 = jnp.maximum(h2 + y[:, h1:] + b2_ref[...], 0.0)

        # fc3 (out_features == 1): off the MXU.  VPU multiply + lane reduce
        # (XLU), scalar bias from SMEM, keepdims (tm, 1) column store.
        q = jnp.sum(h2 * w3_ref[...], axis=1, keepdims=True) + b3_ref[0]
        out_ref[...] = q.astype(out_ref.dtype)

    return kernel


def _pick_tiling(batch, tile_m):
    """Batch tiling: big tiles, even grid length (v7x megacore), bf16-friendly."""
    b16 = _round_up(batch, 16)               # bf16 packs two rows per sublane
    if b16 < 256:
        tm = b16                             # tiny batch: single grid step
    elif b16 <= 2 * tile_m:
        tm = _round_up(_cdiv(b16, 2), 128)   # two tiles -> both v7x TCs busy
    else:
        n = _cdiv(b16, tile_m)
        n += n % 2                           # keep the grid length even
        tm = _round_up(_cdiv(b16, n), 128)
    b_pad = _round_up(b16, tm)
    return tm, b_pad


def critic_forward(obs, action, params, *, tile_m=2048):
    """obs: [B, F] f32, action: [B, A] f32 -> q: [B] f32."""
    w_in, b1, w2o, b2, w3, b3 = params
    B, F = obs.shape
    A = action.shape[1]
    KIN, NOUT = w_in.shape                   # KIN = F + A, NOUT = H1 + H2
    H1 = b1.shape[1]
    H2 = b2.shape[1]
    assert KIN == F + A and NOUT == H1 + H2

    # Merge the two narrow input streams into one lane-friendly bf16 operand.
    x = jnp.concatenate([obs, action], axis=1).astype(jnp.bfloat16)  # (B, F+A)

    tm, B_pad = _pick_tiling(B, tile_m)
    if B_pad != B:
        x = jnp.pad(x, ((0, B_pad - B), (0, 0)))
    grid = (B_pad // tm,)

    def resident(shape):
        # Full-array block + constant index map -> stays VMEM-resident across
        # all grid iterations (no re-DMA per step).
        return pl.BlockSpec(shape, lambda i: (0, 0))

    # Advisory cost so XLA overlaps this latency-bound call with its neighbors.
    flops = 2 * B_pad * (KIN * NOUT + H1 * H2 + H2)
    bytes_accessed = (B_pad * KIN * 2 + B_pad * 4            # streamed in/out
                      + (KIN * NOUT + H1 * H2) * 2           # bf16 weights
                      + (H1 + 2 * H2 + 1) * 4)               # f32 biases + w3
    cost = pl.CostEstimate(flops=flops, transcendentals=0,
                           bytes_accessed=bytes_accessed)

    out = pl.pallas_call(
        _make_kernel(H1),
        out_shape=jax.ShapeDtypeStruct((B_pad, 1), jnp.float32),
        grid=grid,
        in_specs=[
            pl.BlockSpec((tm, KIN), lambda i: (i, 0)),          # [obs|act] tile (bf16)
            resident((KIN, NOUT)),                              # blockdiag(W1, W2a) bf16
            resident((1, H1)),                                  # b1  f32
            resident((H1, H2)),                                 # W2o bf16
            resident((1, H2)),                                  # b2  f32
            resident((1, H2)),                                  # W3 row f32
            pl.BlockSpec(memory_space=pltpu.MemorySpace.SMEM),  # b3 scalar
        ],
        out_specs=pl.BlockSpec((tm, 1), lambda i: (i, 0)),
        compiler_params=pltpu.CompilerParams(
            dimension_semantics=("parallel",),
            vmem_limit_bytes=32 * 1024 * 1024,   # sized for v7x's 64 MiB VMEM too
        ),
        cost_estimate=cost,
    )(x, w_in, b1, w2o, b2, w3, b3)

    # torch's .squeeze(1) + drop batch padding.  Keep the slice adjacent to
    # the call: padded rows hold relu(b1)-driven garbage by construction.
    return out[:B, 0]


def init_params(key, feature_size, action_size, hidden1, hidden2):
    """nn.Linear-style init (U[-1/sqrt(fan_in)]); packed for the fused kernel.

    Hidden dims are zero-padded to multiples of 128 (exact: padded h1/h2
    columns stay 0 through relu and contribute nothing downstream).
    """
    ks = jax.random.split(key, 6)

    def lin(kw, kb, fan_in, fan_out):
        bound = 1.0 / jnp.sqrt(jnp.float32(fan_in))
        w = jax.random.uniform(kw, (fan_in, fan_out), jnp.float32, -bound, bound)
        b = jax.random.uniform(kb, (fan_out,), jnp.float32, -bound, bound)
        return w, b

    F, A = feature_size, action_size
    w1, b1 = lin(ks[0], ks[1], F, hidden1)
    w2, b2 = lin(ks[2], ks[3], hidden1 + A, hidden2)
    w3, b3 = lin(ks[4], ks[5], hidden2, 1)

    H1 = _round_up(hidden1, 128)
    H2 = _round_up(hidden2, 128)

    w1 = jnp.pad(w1, ((0, 0), (0, H1 - hidden1)))
    b1 = jnp.pad(b1, (0, H1 - hidden1))
    w2o = jnp.pad(w2[:hidden1], ((0, H1 - hidden1), (0, H2 - hidden2)))
    w2a = jnp.pad(w2[hidden1:], ((0, 0), (0, H2 - hidden2)))
    b2 = jnp.pad(b2, (0, H2 - hidden2))
    w3 = jnp.pad(w3[:, 0], (0, H2 - hidden2))

    # Fused input weight: [obs|act] @ blockdiag(W1, W2a) -> [h1_pre | act@W2a].
    w_in = jnp.zeros((F + A, H1 + H2), jnp.float32)
    w_in = w_in.at[:F, :H1].set(w1)
    w_in = w_in.at[F:, H1:].set(w2a)

    return (
        w_in.astype(jnp.bfloat16),        # [F+A, H1+H2]  bf16 (MXU)
        b1.reshape(1, H1),                # [1, H1]       f32
        w2o.astype(jnp.bfloat16),         # [H1, H2]      bf16 (MXU)
        b2.reshape(1, H2),                # [1, H2]       f32
        w3.reshape(1, H2),                # [1, H2]       f32 (VPU)
        b3,                               # [1]           f32 (SMEM)
    )


def reference_forward(obs, action, params):
    """Pure-JAX reference mirroring the kernel's bf16 casts (f32 accumulation)."""
    w_in, b1, w2o, b2, w3, b3 = params
    H1 = b1.shape[1]
    f32 = jnp.float32
    x = jnp.concatenate([obs, action], axis=1).astype(jnp.bfloat16).astype(f32)
    y = x @ w_in.astype(f32)
    h1 = jnp.maximum(y[:, :H1] + b1, 0.0)
    h1 = h1.astype(jnp.bfloat16).astype(f32)
    h2 = jnp.maximum(h1 @ w2o.astype(f32) + y[:, H1:] + b2, 0.0)
    return jnp.sum(h2 * w3, axis=1) + b3[0]


if __name__ == "__main__":
    # Small shapes consistent with the module's forward.
    B = 256
    feature_size = 32
    action_size = 8
    hidden1 = 128
    hidden2 = 128

    key = jax.random.PRNGKey(0)
    k_obs, k_act, k_par = jax.random.split(key, 3)

    # feature_extractor is identity; obs is already the feature vector.
    obs = jax.random.normal(k_obs, (B, feature_size), jnp.float32)
    action = jax.random.normal(k_act, (B, action_size), jnp.float32)
    params = init_params(k_par, feature_size, action_size, hidden1, hidden2)

    # B=256 -> tm=128, grid=(2,): exercises the pipeline and both v7x TCs.
    q = critic_forward(obs, action, params)
    q = jax.block_until_ready(q)

    q_ref = reference_forward(obs, action, params)
    assert q.shape == (B,)
    assert jnp.allclose(q, q_ref, atol=1e-2, rtol=1e-2), \
        float(jnp.max(jnp.abs(q - q_ref)))

    print("KERNEL_OK")
</pallas_src>

<mosaic_0001>
module attributes {stable_mosaic.version = 11 : i64} {
  func.func @kernel(%arg0: i32, %arg1: memref<128x40xbf16, #tpu.memory_space<vmem>>, %arg2: memref<40x256xbf16, #tpu.memory_space<vmem>>, %arg3: memref<1x128xf32, #tpu.memory_space<vmem>>, %arg4: memref<128x128xbf16, #tpu.memory_space<vmem>>, %arg5: memref<1x128xf32, #tpu.memory_space<vmem>>, %arg6: memref<1x128xf32, #tpu.memory_space<vmem>>, %arg7: memref<1xf32, #tpu.memory_space<smem>>, %arg8: memref<128x1xf32, #tpu.memory_space<vmem>>) attributes {dimension_semantics = [#tpu.dimension_semantics<parallel>], iteration_bounds = array<i64: 2>, scalar_prefetch = 0 : i64, scratch_operands = 0 : i64, tpu.core_type = #tpu.core_type<tc>, window_params = [{transform_indices = @transform_0, window_bounds = array<i64: 128, 40>}, {pipeline_mode = #tpu.pipeline_mode<synchronous>, transform_indices = @transform_1, window_bounds = array<i64: 40, 256>}, {pipeline_mode = #tpu.pipeline_mode<synchronous>, transform_indices = @transform_2, window_bounds = array<i64: 1, 128>}, {pipeline_mode = #tpu.pipeline_mode<synchronous>, transform_indices = @transform_3, window_bounds = array<i64: 128, 128>}, {pipeline_mode = #tpu.pipeline_mode<synchronous>, transform_indices = @transform_4, window_bounds = array<i64: 1, 128>}, {pipeline_mode = #tpu.pipeline_mode<synchronous>, transform_indices = @transform_5, window_bounds = array<i64: 1, 128>}, {transform_indices = @transform_6, window_bounds = array<i64: 1>}, {transform_indices = @transform_7, window_bounds = array<i64: 128, 1>}]} {
    %c0 = arith.constant 0 : index
    %c0_0 = arith.constant 0 : index
    %0 = vector.load %arg1[%c0, %c0_0] : memref<128x40xbf16, #tpu.memory_space<vmem>>, vector<128x40xbf16>
    %c0_1 = arith.constant 0 : index
    %c0_2 = arith.constant 0 : index
    %1 = vector.load %arg2[%c0_1, %c0_2] : memref<40x256xbf16, #tpu.memory_space<vmem>>, vector<40x256xbf16>
    %cst = arith.constant dense<0.000000e+00> : vector<128x256xf32>
    %2 = tpu.matmul %0, %1, %cst {dimension_numbers = #tpu.dot_dimension_numbers<[1], [0], [0], [1], [0, 0, 1, 1], [], []>} : vector<128x40xbf16>, vector<40x256xbf16>, vector<128x256xf32> -> vector<128x256xf32>
    %3 = vector.extract_strided_slice %2 {offsets = [0, 0], sizes = [128, 128], strides = [1, 1]} : vector<128x256xf32> to vector<128x128xf32>
    %c0_3 = arith.constant 0 : index
    %c0_4 = arith.constant 0 : index
    %4 = vector.load %arg3[%c0_3, %c0_4] : memref<1x128xf32, #tpu.memory_space<vmem>>, vector<1x128xf32>
    %5 = vector.broadcast %4 : vector<1x128xf32> to vector<128x128xf32>
    %6 = arith.addf %3, %5 : vector<128x128xf32>
    %cst_5 = arith.constant 0.000000e+00 : f32
    %7 = vector.broadcast %cst_5 : f32 to vector<128x128xf32>
    %8 = arith.maximumf %6, %7 : vector<128x128xf32>
    %9 = arith.truncf %8 : vector<128x128xf32> to vector<128x128xbf16>
    %c0_6 = arith.constant 0 : index
    %c0_7 = arith.constant 0 : index
    %10 = vector.load %arg4[%c0_6, %c0_7] : memref<128x128xbf16, #tpu.memory_space<vmem>>, vector<128x128xbf16>
    %cst_8 = arith.constant dense<0.000000e+00> : vector<128x128xf32>
    %11 = tpu.matmul %9, %10, %cst_8 {dimension_numbers = #tpu.dot_dimension_numbers<[1], [0], [0], [1], [0, 0, 1, 1], [], []>} : vector<128x128xbf16>, vector<128x128xbf16>, vector<128x128xf32> -> vector<128x128xf32>
    %12 = vector.extract_strided_slice %2 {offsets = [0, 128], sizes = [128, 128], strides = [1, 1]} : vector<128x256xf32> to vector<128x128xf32>
    %13 = arith.addf %11, %12 : vector<128x128xf32>
    %c0_9 = arith.constant 0 : index
    %c0_10 = arith.constant 0 : index
    %14 = vector.load %arg5[%c0_9, %c0_10] : memref<1x128xf32, #tpu.memory_space<vmem>>, vector<1x128xf32>
    %15 = vector.broadcast %14 : vector<1x128xf32> to vector<128x128xf32>
    %16 = arith.addf %13, %15 : vector<128x128xf32>
    %cst_11 = arith.constant 0.000000e+00 : f32
    %17 = vector.broadcast %cst_11 : f32 to vector<128x128xf32>
    %18 = arith.maximumf %16, %17 : vector<128x128xf32>
    %c0_12 = arith.constant 0 : index
    %c0_13 = arith.constant 0 : index
    %19 = vector.load %arg6[%c0_12, %c0_13] : memref<1x128xf32, #tpu.memory_space<vmem>>, vector<1x128xf32>
    %20 = vector.broadcast %19 : vector<1x128xf32> to vector<128x128xf32>
    %21 = arith.mulf %18, %20 : vector<128x128xf32>
    %cst_14 = arith.constant dense<0.000000e+00> : vector<128xf32>
    %22 = vector.multi_reduction <add>, %21, %cst_14 [1] : vector<128x128xf32> to vector<128xf32>
    %23 = vector.shape_cast %22 : vector<128xf32> to vector<128x1xf32>
    %c0_15 = arith.constant 0 : index
    %24 = memref.load %arg7[%c0_15] : memref<1xf32, #tpu.memory_space<smem>>
    %25 = vector.broadcast %24 : f32 to vector<128x1xf32>
    %26 = arith.addf %23, %25 : vector<128x1xf32>
    %c0_16 = arith.constant 0 : index
    %c0_17 = arith.constant 0 : index
    %27 = vector.load %arg8[%c0_16, %c0_17] : memref<128x1xf32, #tpu.memory_space<vmem>>, vector<128x1xf32>
    tpu.vector_store %arg8[%c0_16, %c0_17], %26 {strides = array<i32>} : memref<128x1xf32, #tpu.memory_space<vmem>>, vector<128x1xf32>,
    return
  }
  func.func @transform_0(%arg0: i32) -> (i32, i32) {
    %c0_i32 = arith.constant 0 : i32
    %c0_i32_0 = arith.constant 0 : i32
    return %arg0, %c0_i32 : i32, i32
  }
  func.func @transform_1(%arg0: i32) -> (i32, i32) {
    %c0_i32 = arith.constant 0 : i32
    %c0_i32_0 = arith.constant 0 : i32
    %c0_i32_1 = arith.constant 0 : i32
    return %c0_i32, %c0_i32_0 : i32, i32
  }
  func.func @transform_2(%arg0: i32) -> (i32, i32) {
    %c0_i32 = arith.constant 0 : i32
    %c0_i32_0 = arith.constant 0 : i32
    %c0_i32_1 = arith.constant 0 : i32
    return %c0_i32, %c0_i32_0 : i32, i32
  }
  func.func @transform_3(%arg0: i32) -> (i32, i32) {
    %c0_i32 = arith.constant 0 : i32
    %c0_i32_0 = arith.constant 0 : i32
    %c0_i32_1 = arith.constant 0 : i32
    return %c0_i32, %c0_i32_0 : i32, i32
  }
  func.func @transform_4(%arg0: i32) -> (i32, i32) {
    %c0_i32 = arith.constant 0 : i32
    %c0_i32_0 = arith.constant 0 : i32
    %c0_i32_1 = arith.constant 0 : i32
    return %c0_i32, %c0_i32_0 : i32, i32
  }
  func.func @transform_5(%arg0: i32) -> (i32, i32) {
    %c0_i32 = arith.constant 0 : i32
    %c0_i32_0 = arith.constant 0 : i32
    %c0_i32_1 = arith.constant 0 : i32
    return %c0_i32, %c0_i32_0 : i32, i32
  }
  func.func @transform_6(%arg0: i32) -> i32 {
    %c0_i32 = arith.constant 0 : i32
    %c0_i32_0 = arith.constant 0 : i32
    return %c0_i32 : i32
  }
  func.func @transform_7(%arg0: i32) -> (i32, i32) {
    %c0_i32 = arith.constant 0 : i32
    %c0_i32_0 = arith.constant 0 : i32
    return %arg0, %c0_i32 : i32, i32
  }
}

</mosaic_0001>

<bundles_post_ra>
// kernel: tpu_custom_call.1
= control target key start
LH: loop header
LB: loop body
LE: loop exit
PB: predicated region body
PF: predicated region fallthrough
CT: control target
= control target key end

     0   :  { %s1086_s26 = smov 0   ;;  %s1306_s0 = inlined_call_operand.vmem [shape: bf16[256,40], index: 0, kind: input, shape index: {}]   ;;  %s1307_s1 = inlined_call_operand.vmem [shape: bf16[40,256], index: 1, kind: input, shape index: {}]   ;;  %s1308_s2 = inlined_call_operand.vmem [shape: f32[1,128], index: 2, kind: input, shape index: {}]   ;;  %s1309_s3 = inlined_call_operand.vmem [shape: bf16[128,128], index: 3, kind: input, shape index: {}]   ;;  %s1310_s4 = inlined_call_operand.vmem [shape: f32[1,128], index: 4, kind: input, shape index: {}]   ;;  %s1311_s5 = inlined_call_operand.vmem [shape: f32[1,128], index: 5, kind: input, shape index: {}]   ;;  %s1312_s6 = inlined_call_operand.<no memory space> [shape: f32[1], index: 6, kind: input, shape index: {}]   ;;  %s1313_s7 = inlined_call_operand.vmem [shape: f32[256,1], index: 7, kind: output, shape index: {}]  }
   0x1   :  { %12 = sst [smem:[#allocation2]] %s1312_s6 }
   0x2 LB: > { %s908_s27 = sadd.s32 4294967295, %s1040_s26   ;;  %p912_p0 = scmp.ge.s32.totalorder %s1040_s26, 1  ;;  %s1040_s26 = sphi %s1086_s26, %s18_s26  }
   0x3   : > { %p239_p1 = scmp.lt.s32.totalorder %s1040_s26, 3 }
   0x5   : > { %p240_p2 = pnand %p912_p0, %p239_p1 }
   0x6   : > { %s913_s6 = sshll.u32 (!%p240_p2), %s908_s27, 4  ;;  %s817_s19 = sld [smem:[#allocation2]] (!%p240_p2) }
   0x7   : > { %243 = sbr.rel (%p240_p2) target bundleno = 638 (0x27e), region = 48  ;;  %p272_p3 = scmp.lt.s32.totalorder (!%p240_p2), %s913_s6, 31 }
   0xc   : > { %v304_v0 = vld [vmem:[%s1307_s1 + $0x20] sm:$0xff]  ;;  %vm395_vm0 = vcmask 1043456   ;;  %v1012_v3 = vld [vmem:[%s1307_s1 + $0x14] ss:$8 sps:$4 sm:$0xff]   ;;  %v1042_v4 = vmov 0   ;;  %s1315_s6 = smov (!%p272_p3, %s913_s6), 31 }
   0xd   : > { %v930_v1 = vcombine.high %v304_v0, %v304_v0  ;;  %v929_v2 = vcombine.low %v304_v0, %v304_v0  ;;  %434 = vmatprep.mubr.bf16.mxu0 %v1042_v4  ;;  %v1014_v5 = vld [vmem:[%s1307_s1 + $0x10] ss:$8 sps:$4 sm:$0xff]   ;;  %v1015_v7 = vld [vmem:[%s1307_s1 + $0x4] ss:$8 sps:$4 sm:$0xff]   ;;  %s914_s15 = sshll.u32 %s1315_s6, 2  ;;  %vm370_vm1 = vcmask 326656  }
   0xe   : > { %v1026_v8 = vld [vmem:[%s1309_s3 + $0x38] sm:$0xff]   ;;  %v1027_v9 = vld [vmem:[%s1309_s3 + $0x30] sm:$0xff]   ;;  %s1118_s20 = scalar_lea.vmem %s1306_s0, %s914_s15  ;;  %v1017_v10 = vld [vmem:[%s1307_s1] ss:$8 sps:$4 sm:$0xff]   ;;  %vm835_vm2 = vcmask 7168  }
   0xf   : > { %931 = vmatprep.subr.msk.bf16.mxu0 %vm395_vm0, %v930_v1  ;;  %v397_v6 = vsel %vm395_vm0, %v929_v2, 0  ;;  %969 = vmatprep.subr.bf16.mxu1 %v1026_v8  ;;  %v1028_v11 = vld [vmem:[%s1309_s3 + $0x28] sm:$0xff]   ;;  %v1018_v12 = vld [vmem:[%s1118_s20] sm:$0xff]   ;;  %v1020_v15 = vld [vmem:[%s1118_s20 + $0x10] sm:$0xff]  }
  0x10   : > { %413 = vmatpush1.bf16.msra.mxu0 %v397_v6  ;;  %970 = vmatpush3.bf16.msra.mxu1 %v1026_v8  ;;  %v1029_v13 = vld [vmem:[%s1309_s3 + $0x20] sm:$0xff]   ;;  %v1019_v14 = vld [vmem:[%s1118_s20 + $0x8] sm:$0xff]   ;;  %v1021_v16 = vld [vmem:[%s1118_s20 + $0x18] sm:$0xff]  }
  0x11   : > { %414 = vmatprep.subr.bf16.mxu0 %v1012_v3  ;;  %971 = vmatprep.subr.bf16.mxu1 %v1027_v9  ;;  %v1022_v17 = vld [vmem:[%s1118_s20 + $0x20] sm:$0xff]   ;;  %v1023_v18 = vld [vmem:[%s1118_s20 + $0x28] sm:$0xff]   ;;  %v1024_v19 = vld [vmem:[%s1118_s20 + $0x30] sm:$0xff]  }
  0x12   : > { %v1025_v20 = vld [vmem:[%s1118_s20 + $0x38] sm:$0xff]   ;;  %v1031_v22 = vld [vmem:[%s1309_s3 + $0x10] sm:$0xff]   ;;  %v1032_v23 = vld [vmem:[%s1309_s3 + $0x8] sm:$0xff]   ;;  %s916_s20 = sshll.u32 %s1315_s6, 3 }
  0x13   : > { %v1030_v21 = vld [vmem:[%s1309_s3 + $0x18] sm:$0xff]   ;;  %v1033_v24 = vld [vmem:[%s1309_s3] sm:$0xff]   ;;  %s1269_s23 = scalar_lea.vmem %s1313_s7, %s916_s20 }
  0x14   : > { %415 = vmatpush1.bf16.msra.mxu0 %v1014_v5  ;;  %972 = vmatpush3.bf16.msra.mxu1 %v1027_v9  ;;  %v1160_v26 = vld [vmem:[%s1308_s2] ss:$0 sm:$0xff] }
  0x15   : > { %416 = vmatprep.subr.bf16.mxu0 %v1015_v7  ;;  %973 = vmatprep.subr.bf16.mxu1 %v1028_v11 }
  0x18   : > { %417 = vmatpush1.bf16.msra.mxu0 %v1017_v10  ;;  %974 = vmatpush3.bf16.msra.mxu1 %v1028_v11 }
  0x19   : > { %975 = vmatprep.subr.bf16.mxu1 %v1029_v13 }
  0x1b   : > { %932 = vmatmul.mubr.msk.bf16.vlgmr.msra.gmra.mxu0 %vm370_vm1, %v1018_v12 }
  0x1c   : > { %444 = vmatprep.mubr.bf16.mxu0 %v1042_v4  ;;  %976 = vmatpush3.bf16.msra.mxu1 %v1029_v13 }
  0x1d   : > { %977 = vmatprep.subr.bf16.mxu1 %v1030_v21 }
  0x20   : > { %978 = vmatpush3.bf16.msra.mxu1 %v1030_v21 }
  0x21   : > { %979 = vmatprep.subr.bf16.mxu1 %v1031_v22 }
  0x23   : > { %933 = vmatmul.mubr.msk.bf16.gmra.mxu0 %vm370_vm1, %v1019_v14 }
  0x24   : > { %454 = vmatprep.mubr.bf16.mxu0 %v1042_v4  ;;  %980 = vmatpush3.bf16.msra.mxu1 %v1031_v22 }
  0x25   : > { %981 = vmatprep.subr.bf16.mxu1 %v1032_v23 }
  0x28   : > { %982 = vmatpush3.bf16.msra.mxu1 %v1032_v23 }
  0x29   : > { %983 = vmatprep.subr.bf16.mxu1 %v1033_v24 }
  0x2b   : > { %934 = vmatmul.mubr.msk.bf16.gmra.mxu0 %vm370_vm1, %v1020_v15 }
  0x2c   : > { %464 = vmatprep.mubr.bf16.mxu0 %v1042_v4  ;;  %984 = vmatpush3.bf16.msra.mxu1 %v1033_v24 }
  0x33   : > { %935 = vmatmul.mubr.msk.bf16.gmra.mxu0 %vm370_vm1, %v1021_v16 }
  0x34   : > { %474 = vmatprep.mubr.bf16.mxu0 %v1042_v4 }
  0x3b   : > { %936 = vmatmul.mubr.msk.bf16.gmra.mxu0 %vm370_vm1, %v1022_v17 }
  0x3c   : > { %484 = vmatprep.mubr.bf16.mxu0 %v1042_v4 }
  0x43   : > { %937 = vmatmul.mubr.msk.bf16.gmra.mxu0 %vm370_vm1, %v1023_v18 }
  0x44   : > { %494 = vmatprep.mubr.bf16.mxu0 %v1042_v4 }
  0x4b   : > { %938 = vmatmul.mubr.msk.bf16.gmra.mxu0 %vm370_vm1, %v1024_v19 }
  0x4c   : > { %504 = vmatprep.mubr.bf16.mxu0 %v1042_v4 }
  0x53   : > { %939 = vmatmul.mubr.msk.bf16.gmra.mxu0 %vm370_vm1, %v1025_v20 }
  0xdb   : > { %v436_v25 = vpop.f32.mrf.mxu0 }
  0xdc   : > { %v522_v28 = vadd.f32 %v1160_v26, %v436_v25 }
  0xdd   : > { %v1162_v27 = vpop.f32.mrf.mxu0 }
  0xde   : > { %v538_v32 = vmax.f32 %v522_v28, 0.0 }
  0xdf   : > { %v440_v29 = vpop.f32.mrf.mxu0 }
  0xe0   : > { %v523_v30 = vadd.f32 %v1160_v26, %v440_v29 }
  0xe1   : > { %v1166_v31 = vpop.f32.mrf.mxu0 }
  0xe2   : > { %v539_v33 = vmax.f32 %v523_v30, 0.0 }
  0xe3   : > { %v446_v34 = vpop.f32.mrf.mxu0 }
  0xe4   : > { %v554_v35 = vpack.c.bf16 %v539_v33, %v538_v32  ;;  %v524_v37 = vadd.f32 %v1160_v26, %v446_v34 }
  0xe5   : > { %v1168_v36 = vpop.f32.mrf.mxu0 }
  0xe6   : > { %985 = vmatprep.mubr.bf16.mxu1 %v554_v35  ;;  %v540_v41 = vmax.f32 %v524_v37, 0.0 }
  0xe7   : > { %v450_v38 = vpop.f32.mrf.mxu0 }
  0xe8   : > { %v525_v39 = vadd.f32 %v1160_v26, %v450_v38  ;;  %v1211_v38 = vld [vmem:[%s1310_s4] ss:$0 sm:$0xff] }
  0xe9   : > { %v1172_v40 = vpop.f32.mrf.mxu0 }
  0xea   : > { %v541_v42 = vmax.f32 %v525_v39, 0.0 }
  0xeb   : > { %v456_v43 = vpop.f32.mrf.mxu0 }
  0xec   : > { %v555_v44 = vpack.c.bf16 %v541_v42, %v540_v41  ;;  %v526_v46 = vadd.f32 %v1160_v26, %v456_v43 }
  0xed   : > { %v1174_v45 = vpop.f32.mrf.mxu0 }
  0xee   : > { %986 = vmatmul.mubr.bf16.vlgmr.msra.gmra.mxu1 %v555_v44  ;;  %v542_v50 = vmax.f32 %v526_v46, 0.0 }
  0xef   : > { %v460_v47 = vpop.f32.mrf.mxu0 }
  0xf0   : > { %v527_v48 = vadd.f32 %v1160_v26, %v460_v47 }
  0xf1   : > { %v1178_v49 = vpop.f32.mrf.mxu0 }
  0xf2   : > { %v543_v51 = vmax.f32 %v527_v48, 0.0 }
  0xf3   : > { %v466_v52 = vpop.f32.mrf.mxu0 }
  0xf4   : > { %v556_v53 = vpack.c.bf16 %v543_v51, %v542_v50  ;;  %v528_v55 = vadd.f32 %v1160_v26, %v466_v52 }
  0xf5   : > { %v1180_v54 = vpop.f32.mrf.mxu0 }
  0xf6   : > { %989 = vmatprep.mubr.bf16.mxu1 %v556_v53  ;;  %v544_v59 = vmax.f32 %v528_v55, 0.0 }
  0xf7   : > { %v470_v56 = vpop.f32.mrf.mxu0 }
  0xf8   : > { %v529_v57 = vadd.f32 %v1160_v26, %v470_v56 }
  0xf9   : > { %v1184_v58 = vpop.f32.mrf.mxu0 }
  0xfa   : > { %v545_v60 = vmax.f32 %v529_v57, 0.0 }
  0xfb   : > { %v476_v61 = vpop.f32.mrf.mxu0 }
  0xfc   : > { %v557_v62 = vpack.c.bf16 %v545_v60, %v544_v59  ;;  %v530_v0 = vadd.f32 %v1160_v26, %v476_v61 }
  0xfd   : > { %v1186_v63 = vpop.f32.mrf.mxu0 }
  0xfe   : > { %990 = vmatmul.mubr.bf16.gmra.mxu1 %v557_v62  ;;  %v546_v4 = vmax.f32 %v530_v0, 0.0 }
  0xff   : > { %v480_v1 = vpop.f32.mrf.mxu0 }
 0x100   : > { %v531_v2 = vadd.f32 %v1160_v26, %v480_v1 }
 0x101   : > { %v1190_v3 = vpop.f32.mrf.mxu0 }
 0x102   : > { %v547_v5 = vmax.f32 %v531_v2, 0.0 }
 0x103   : > { %v486_v6 = vpop.f32.mrf.mxu0 }
 0x104   : > { %v558_v7 = vpack.c.bf16 %v547_v5, %v546_v4  ;;  %v532_v9 = vadd.f32 %v1160_v26, %v486_v6 }
 0x105   : > { %v1192_v8 = vpop.f32.mrf.mxu0 }
 0x106   : > { %993 = vmatprep.mubr.bf16.mxu1 %v558_v7  ;;  %v548_v13 = vmax.f32 %v532_v9, 0.0 }
 0x107   : > { %v490_v10 = vpop.f32.mrf.mxu0 }
 0x108   : > { %v533_v11 = vadd.f32 %v1160_v26, %v490_v10 }
 0x109   : > { %v1196_v12 = vpop.f32.mrf.mxu0 }
 0x10a   : > { %v549_v14 = vmax.f32 %v533_v11, 0.0 }
 0x10b   : > { %v496_v15 = vpop.f32.mrf.mxu0 }
 0x10c   : > { %v559_v16 = vpack.c.bf16 %v549_v14, %v548_v13  ;;  %v534_v18 = vadd.f32 %v1160_v26, %v496_v15 }
 0x10d   : > { %v1198_v17 = vpop.f32.mrf.mxu0 }
 0x10e   : > { %994 = vmatmul.mubr.bf16.gmra.mxu1 %v559_v16  ;;  %v550_v22 = vmax.f32 %v534_v18, 0.0 }
 0x10f   : > { %v500_v19 = vpop.f32.mrf.mxu0 }
 0x110   : > { %v535_v20 = vadd.f32 %v1160_v26, %v500_v19 }
 0x111   : > { %v1202_v21 = vpop.f32.mrf.mxu0 }
 0x112   : > { %v551_v23 = vmax.f32 %v535_v20, 0.0 }
 0x113   : > { %v506_v24 = vpop.f32.mrf.mxu0 }
 0x114   : > { %v560_v25 = vpack.c.bf16 %v551_v23, %v550_v22  ;;  %v536_v29 = vadd.f32 %v1160_v26, %v506_v24 }
 0x115   : > { %v1204_v28 = vpop.f32.mrf.mxu0 }
 0x116   : > { %997 = vmatprep.mubr.bf16.mxu1 %v560_v25  ;;  %v552_v33 = vmax.f32 %v536_v29, 0.0 }
 0x117   : > { %v510_v30 = vpop.f32.mrf.mxu0 }
 0x118   : > { %v537_v32 = vadd.f32 %v1160_v26, %v510_v30  ;;  %v1219_v26 = vld [vmem:[%s1311_s5] ss:$0 sm:$0xff] }
 0x11a   : > { %v553_v34 = vmax.f32 %v537_v32, 0.0 }
 0x11c   : > { %v561_v35 = vpack.c.bf16 %v553_v34, %v552_v33 }
 0x11e   : > { %998 = vmatmul.mubr.bf16.gmra.mxu1 %v561_v35 }
 0x1ae   : > { %v987_v37 = vpop.f32.mrf.mxu1 }
 0x1af   : > { %v669_v39 = vadd.f32 %v987_v37, %v1168_v36 }
 0x1b0   : > { %v660_v41 = vpop.f32.mrf.mxu1 }
 0x1b1   : > { %v661_v42 = vadd.f32 %v660_v41, %v1162_v27  ;;  %v732_v43 = vadd.f32 %v1211_v38, %v669_v39 }
 0x1b2   : > { %v988_v44 = vpop.f32.mrf.mxu1 }
 0x1b3   : > { %v672_v46 = vadd.f32 %v988_v44, %v1172_v40  ;;  %v748_v47 = vmax.f32 %v732_v43, 0.0  ;;  %v730_v48 = vadd.f32 %v1211_v38, %v661_v42  ;;  %v512_v44 = vpop.f32.mrf.mxu0 }
 0x1b4   : > { %v663_v50 = vpop.f32.mrf.mxu1 }
 0x1b5   : > { %v733_v51 = vadd.f32 %v1211_v38, %v672_v46  ;;  %v664_v36 = vadd.f32 %v663_v50, %v1166_v31  ;;  %v771_v27 = vmul.f32 %v1219_v26, %v748_v47  ;;  %v746_v52 = vmax.f32 %v730_v48, 0.0 }
 0x1b7   : > { %v749_v53 = vmax.f32 %v733_v51, 0.0  ;;  %v731_v55 = vadd.f32 %v1211_v38, %v664_v36  ;;  %789 = vadd.xlane.f32.xlu1 %v771_v27  ;;  %v769_v56 = vmul.f32 %v1219_v26, %v746_v52 }
 0x1b9   : > { %v747_v57 = vmax.f32 %v731_v55, 0.0  ;;  %785 = vadd.xlane.f32.xlu0 %v769_v56  ;;  %v772_v40 = vmul.f32 %v1219_v26, %v749_v53 }
 0x1bb   : > { %791 = vadd.xlane.f32.xlu1 %v772_v40  ;;  %v770_v59 = vmul.f32 %v1219_v26, %v747_v57 }
 0x1bd   : > { %787 = vadd.xlane.f32.xlu0 %v770_v59 }
 0x1be   : > { %v991_v60 = vpop.f32.mrf.mxu1 }
 0x1bf   : > { %v685_v31 = vadd.f32 %v991_v60, %v1180_v54 }
 0x1c0   : > { %v676_v61 = vpop.f32.mrf.mxu1 }
 0x1c1   : > { %v736_v62 = vadd.f32 %v1211_v38, %v685_v31  ;;  %v677_v0 = vadd.f32 %v676_v61, %v1174_v45 }
 0x1c2   : > { %v992_v1 = vpop.f32.mrf.mxu1 }
 0x1c3   : > { %v752_v2 = vmax.f32 %v736_v62, 0.0  ;;  %v734_v4 = vadd.f32 %v1211_v38, %v677_v0  ;;  %v688_v5 = vadd.f32 %v992_v1, %v1184_v58 }
 0x1c4   : > { %v679_v6 = vpop.f32.mrf.mxu1 }
 0x1c5   : > { %v750_v7 = vmax.f32 %v734_v4, 0.0  ;;  %v737_v9 = vadd.f32 %v1211_v38, %v688_v5  ;;  %v680_v10 = vadd.f32 %v679_v6, %v1178_v49  ;;  %v775_v11 = vmul.f32 %v1219_v26, %v752_v2 }
 0x1c7   : > { %v753_v54 = vmax.f32 %v737_v9, 0.0  ;;  %v735_v13 = vadd.f32 %v1211_v38, %v680_v10  ;;  %797 = vadd.xlane.f32.xlu0 %v775_v11  ;;  %v773_v45 = vmul.f32 %v1219_v26, %v750_v7 }
 0x1c9   : > { %v751_v14 = vmax.f32 %v735_v13, 0.0  ;;  %v776_v15 = vmul.f32 %v1219_v26, %v753_v54 }
 0x1cb   : > { %793 = vadd.xlane.f32.xlu0 %v773_v45  ;;  %799 = vadd.xlane.f32.xlu1 %v776_v15  ;;  %v774_v58 = vmul.f32 %v1219_v26, %v751_v14 }
 0x1ce   : > { %v995_v16 = vpop.f32.mrf.mxu1 }
 0x1cf   : > { %v701_v18 = vadd.f32 %v995_v16, %v1192_v8  ;;  %795 = vadd.xlane.f32.xlu1 %v774_v58 }
 0x1d0   : > { %v692_v49 = vpop.f32.mrf.mxu1 }
 0x1d1   : > { %v740_v19 = vadd.f32 %v1211_v38, %v701_v18  ;;  %v693_v20 = vadd.f32 %v692_v49, %v1186_v63 }
 0x1d2   : > { %v996_v22 = vpop.f32.mrf.mxu1 }
 0x1d3   : > { %v756_v23 = vmax.f32 %v740_v19, 0.0  ;;  %v738_v24 = vadd.f32 %v1211_v38, %v693_v20  ;;  %v704_v25 = vadd.f32 %v996_v22, %v1196_v12 }
 0x1d4   : > { %v695_v29 = vpop.f32.mrf.mxu1 }
 0x1d5   : > { %v754_v30 = vmax.f32 %v738_v24, 0.0  ;;  %v741_v32 = vadd.f32 %v1211_v38, %v704_v25  ;;  %v696_v33 = vadd.f32 %v695_v29, %v1190_v3  ;;  %v779_v8 = vmul.f32 %v1219_v26, %v756_v23 }
 0x1d7   : > { %v757_v34 = vmax.f32 %v741_v32, 0.0  ;;  %v739_v35 = vadd.f32 %v1211_v38, %v696_v33  ;;  %805 = vadd.xlane.f32.xlu0 %v779_v8  ;;  %v777_v63 = vmul.f32 %v1219_v26, %v754_v30 }
 0x1d9   : > { %v755_v37 = vmax.f32 %v739_v35, 0.0  ;;  %v780_v39 = vmul.f32 %v1219_v26, %v757_v34 }
 0x1db   : > { %801 = vadd.xlane.f32.xlu0 %v777_v63  ;;  %807 = vadd.xlane.f32.xlu1 %v780_v39  ;;  %v778_v12 = vmul.f32 %v1219_v26, %v755_v37 }
 0x1de   : > { %v999_v41 = vpop.f32.mrf.mxu1 }
 0x1df   : > { %v717_v42 = vadd.f32 %v999_v41, %v1204_v28  ;;  %803 = vadd.xlane.f32.xlu1 %v778_v12 }
 0x1e0   : > { %v708_v3 = vpop.f32.mrf.mxu1 }
 0x1e1   : > { %v709_v43 = vadd.f32 %v708_v3, %v1198_v17  ;;  %v744_v47 = vadd.f32 %v1211_v38, %v717_v42 }
 0x1e2   : > { %v1000_v46 = vpop.f32.mrf.mxu1 }
 0x1e3   : > { %v742_v48 = vadd.f32 %v1211_v38, %v709_v43  ;;  %v720_v50 = vadd.f32 %v1000_v46, %v512_v44  ;;  %v760_v52 = vmax.f32 %v744_v47, 0.0 }
 0x1e4   : > { %v711_v51 = vpop.f32.mrf.mxu1 }
 0x1e5   : > { %v758_v36 = vmax.f32 %v742_v48, 0.0  ;;  %v712_v27 = vadd.f32 %v711_v51, %v1202_v21  ;;  %v745_v53 = vadd.f32 %v1211_v38, %v720_v50  ;;  %v783_v40 = vmul.f32 %v1219_v26, %v760_v52 }
 0x1e6   : > { %v818_v21 = vstv %s817_s19 }
 0x1e7   : > { %v743_v28 = vadd.f32 %v1211_v38, %v712_v27  ;;  %v781_v55 = vmul.f32 %v1219_v26, %v758_v36  ;;  %v761_v56 = vmax.f32 %v745_v53, 0.0 }
 0x1e9   : > { %v759_v17 = vmax.f32 %v743_v28, 0.0  ;;  %809 = vadd.xlane.f32.xlu0 %v781_v55  ;;  %v784_v59 = vmul.f32 %v1219_v26, %v761_v56 }
 0x1eb   : > { %v782_v57 = vmul.f32 %v1219_v26, %v759_v17 }
 0x1ed   : > { %811 = vadd.xlane.f32.xlu1 %v782_v57  ;;  %813 = vadd.xlane.f32.xlu0 %v783_v40 }
 0x1f1   : > { %815 = vadd.xlane.f32.xlu1 %v784_v59 }
 0x240   : > { %v790_v38 = vpop.xlane.xlu1 %789 }
 0x241   : > { %v821_v60 = vadd.f32 %v818_v21, %v790_v38 }
 0x242   : > { %v786_v31 = vpop.xlane.xlu0 %785 }
 0x243   : > { %838 = vst.msk [vmem:[%s1269_s23 + $0x10] sm:$0xff] %vm835_vm2, %v821_v60  ;;  %v819_v26 = vadd.f32 %v818_v21, %v786_v31 }
 0x244   : > { %v792_v61 = vpop.xlane.xlu1 %791 }
 0x245   : > { %836 = vst.msk [vmem:[%s1269_s23] sm:$0xff] %vm835_vm2, %v819_v26  ;;  %v822_v62 = vadd.f32 %v818_v21, %v792_v61 }
 0x246   : > { %v788_v0 = vpop.xlane.xlu0 %787 }
 0x247   : > { %839 = vst.msk [vmem:[%s1269_s23 + $0x18] sm:$0xff] %vm835_vm2, %v822_v62  ;;  %v820_v1 = vadd.f32 %v818_v21, %v788_v0 }
 0x249   : > { %837 = vst.msk [vmem:[%s1269_s23 + $0x8] sm:$0xff] %vm835_vm2, %v820_v1 }
 0x250   : > { %v798_v2 = vpop.xlane.xlu0 %797 }
 0x251   : > { %v825_v4 = vadd.f32 %v818_v21, %v798_v2 }
 0x253   : > { %842 = vst.msk [vmem:[%s1269_s23 + $0x30] sm:$0xff] %vm835_vm2, %v825_v4 }
 0x254   : > { %v794_v5 = vpop.xlane.xlu0 %793  ;;  %v800_v6 = vpop.xlane.xlu1 %799 }
 0x255   : > { %v823_v7 = vadd.f32 %v818_v21, %v794_v5  ;;  %v826_v9 = vadd.f32 %v818_v21, %v800_v6 }
 0x257   : > { %840 = vst.msk [vmem:[%s1269_s23 + $0x20] sm:$0xff] %vm835_vm2, %v823_v7  ;;  %843 = vst.msk [vmem:[%s1269_s23 + $0x38] sm:$0xff] %vm835_vm2, %v826_v9 }
 0x258   : > { %v796_v10 = vpop.xlane.xlu1 %795 }
 0x259   : > { %v824_v11 = vadd.f32 %v818_v21, %v796_v10 }
 0x25b   : > { %841 = vst.msk [vmem:[%s1269_s23 + $0x28] sm:$0xff] %vm835_vm2, %v824_v11 }
 0x260   : > { %v806_v54 = vpop.xlane.xlu0 %805 }
 0x261   : > { %v829_v13 = vadd.f32 %v818_v21, %v806_v54 }
 0x263   : > { %846 = vst.msk [vmem:[%s1269_s23 + $0x50] sm:$0xff] %vm835_vm2, %v829_v13 }
 0x264   : > { %v802_v14 = vpop.xlane.xlu0 %801  ;;  %v808_v45 = vpop.xlane.xlu1 %807 }
 0x265   : > { %v827_v15 = vadd.f32 %v818_v21, %v802_v14  ;;  %v830_v58 = vadd.f32 %v818_v21, %v808_v45 }
 0x267   : > { %844 = vst.msk [vmem:[%s1269_s23 + $0x40] sm:$0xff] %vm835_vm2, %v827_v15  ;;  %847 = vst.msk [vmem:[%s1269_s23 + $0x58] sm:$0xff] %vm835_vm2, %v830_v58 }
 0x268   : > { %v804_v16 = vpop.xlane.xlu1 %803 }
 0x269   : > { %v828_v18 = vadd.f32 %v818_v21, %v804_v16 }
 0x26b   : > { %845 = vst.msk [vmem:[%s1269_s23 + $0x48] sm:$0xff] %vm835_vm2, %v828_v18 }
 0x272   : > { %v810_v49 = vpop.xlane.xlu0 %809 }
 0x273   : > { %v831_v19 = vadd.f32 %v818_v21, %v810_v49 }
 0x275   : > { %848 = vst.msk [vmem:[%s1269_s23 + $0x60] sm:$0xff] %vm835_vm2, %v831_v19 }
 0x276   : > { %v812_v20 = vpop.xlane.xlu1 %811  ;;  %v814_v22 = vpop.xlane.xlu0 %813 }
 0x277   : > { %v832_v23 = vadd.f32 %v818_v21, %v812_v20  ;;  %v833_v24 = vadd.f32 %v818_v21, %v814_v22 }
 0x279   : > { %849 = vst.msk [vmem:[%s1269_s23 + $0x68] sm:$0xff] %vm835_vm2, %v832_v23  ;;  %850 = vst.msk [vmem:[%s1269_s23 + $0x70] sm:$0xff] %vm835_vm2, %v833_v24 }
 0x27a   : > { %v816_v25 = vpop.xlane.xlu1 %815 }
 0x27b   : > { %v834_v29 = vadd.f32 %v818_v21, %v816_v25 }
 0x27d   : > { %851 = vst.msk [vmem:[%s1269_s23 + $0x78] sm:$0xff] %vm835_vm2, %v834_v29 }
 0x27e PF: > { %s18_s26 = sadd.s32 1, %s1040_s26  }
 0x27f   : > { %p15_p4 = scmp.ge.s32.totalorder %s18_s26, 4  }
 0x281   :  { %17 = sbr.rel (!%p15_p4) target bundleno = 2 (0x2), region = 78 }

</bundles_post_ra>
